<compile_context>
chip_gen: v5e
topology: v5e:2x2
jax: 0.10.0
libtpu: 0.0.40
codegen_flags: <defaults>
</compile_context>

<pallas_src>
import jax
import jax.numpy as jnp
from jax.experimental import pallas as pl
from jax.experimental.pallas import tpu as pltpu

_LANE = 128
_SUBLANE = 8
_BIG = 1e30  # added to ||c||^2 of padded cluster columns -> numerator ~ 0
_MAX_TB = 512


def _round_up(x: int, m: int) -> int:
    return ((x + m - 1) // m) * m


def _vmem_capacity_bytes() -> int:
    """Per-core VMEM capacity; conservative fallback if the query fails."""
    try:
        info = pltpu.get_tpu_info()
        cap = getattr(info, "vmem_capacity_bytes", None)
        if cap:
            return int(cap)
    except Exception:
        pass
    return 64 * 1024 * 1024  # v7x per-TC physical VMEM (smallest of v5e/v6e/v7x)


def _make_dec_kernel(alpha: float):
    inv_alpha = 1.0 / float(alpha)
    power = (float(alpha) + 1.0) / 2.0

    def dec_kernel(x_ref, w1_ref, b1_ref, w2_ref, b2_ref, ct_ref, csq_ref, out_ref):
        # --- encoder: Linear -> ReLU -> Linear.  bf16 MXU operands, f32 accum.
        x = x_ref[...].astype(jnp.bfloat16)                              # [TB, Din_p]
        h = jnp.dot(x, w1_ref[...], preferred_element_type=jnp.float32)  # f32
        h = jnp.maximum(h + b1_ref[...], 0.0)                            # [TB, H_p] f32
        e = jnp.dot(h.astype(jnp.bfloat16), w2_ref[...],
                    preferred_element_type=jnp.float32)
        e = e + b2_ref[...]                                              # [TB, H_p] f32

        # --- cluster soft assignment (Student's t kernel) ---
        # ||e - c||^2 = ||e||^2 + ||c||^2 - 2 e.c ; ||c||^2 is batch-invariant,
        # precomputed in f32 in the wrapper (padded columns hold +_BIG).
        e_sq = jnp.sum(e * e, axis=-1, keepdims=True)                    # [TB, 1] f32
        cross = jnp.dot(e.astype(jnp.bfloat16), ct_ref[...],
                        preferred_element_type=jnp.float32)              # [TB, K_p]
        norm_sq = jnp.maximum(e_sq + csq_ref[...] - 2.0 * cross, 0.0)

        base = 1.0 + norm_sq * inv_alpha
        if power == 1.0:                       # static python check: alpha == 1.0
            num = pl.reciprocal(base, approx=True)       # EUP
        else:
            num = base ** (-power)                        # single EUP pow
        denom = jnp.sum(num, axis=1, keepdims=True)
        out_ref[...] = num * pl.reciprocal(denom, approx=True)

    return dec_kernel


def _choose_batch_tile(batch: int, din_p: int, h_p: int, k_p: int,
                       budget_bytes: int, weight_buffers: int) -> int:
    """Largest batch tile whose *total* VMEM residency fits the budget."""
    # Resident parameter blocks (bf16 weights, f32 biases / csq).
    fixed = weight_buffers * 2 * (din_p * h_p + h_p * h_p + h_p * k_p)
    fixed += weight_buffers * 4 * (2 * h_p + k_p)
    # Per-batch-row bytes:
    #   x tile (f32, double-buffered) + in-kernel bf16 copy      : 8*Din_p + 2*Din_p
    #   h/e f32 + their bf16 casts                               : 12*H_p
    #   out tile (f32, double-buffered) + cross/num f32 temps    : 8*K_p + 8*K_p
    per_row = 10 * din_p + 12 * h_p + 16 * k_p
    avail = max(budget_bytes - fixed, per_row * _SUBLANE)
    tb = max(_SUBLANE, min(_MAX_TB, (avail // per_row) // _SUBLANE * _SUBLANE))
    tb = min(tb, _round_up(batch, _SUBLANE))
    # Make sure the grid has >=2 steps when the batch allows (v7x two-TC sharding;
    # also overlaps x DMA with compute on single-TC chips).
    if batch >= 2 * _SUBLANE and -(-batch // tb) < 2:
        tb = _round_up(-(-batch // 2), _SUBLANE)
    return tb


def prepare_dec_params(w1, b1, w2, b2, centers):
    """One-time padding / casting of DEC parameters (hoisted out of the per-call path).

    w1: [Din, H] (pre-transposed, i.e. x @ w1), b1: [H],
    w2: [H, H] (pre-transposed), b2: [H], centers: [K, H].
    """
    din, H = w1.shape
    K = centers.shape[0]
    din_p = _round_up(din, _LANE)
    h_p = _round_up(H, _LANE)
    k_p = _round_up(K, _LANE)

    bf16, f32 = jnp.bfloat16, jnp.float32
    w1_p = jnp.zeros((din_p, h_p), bf16).at[:din, :H].set(w1.astype(bf16))
    b1_p = jnp.zeros((1, h_p), f32).at[0, :H].set(b1.astype(f32))
    w2_p = jnp.zeros((h_p, h_p), bf16).at[:H, :H].set(w2.astype(bf16))
    b2_p = jnp.zeros((1, h_p), f32).at[0, :H].set(b2.astype(f32))
    ct_p = jnp.zeros((h_p, k_p), bf16).at[:H, :K].set(centers.astype(bf16).T)
    # Batch-invariant ||c||^2 in f32; padded cluster columns get a huge offset
    # so their (un-normalized) assignment collapses to ~0.
    csq = jnp.sum(centers.astype(f32) ** 2, axis=1)                       # [K]
    csq_p = jnp.full((1, k_p), _BIG, f32).at[0, :K].set(csq)

    return dict(w1=w1_p, b1=b1_p, w2=w2_p, b2=b2_p, ct=ct_p, csq=csq_p,
                din=din, hidden=H, k=K)


def _dec_call(x_p, params, alpha: float, batch: int, single_buffer_weights: bool):
    din_p, h_p = params["w1"].shape
    k_p = params["ct"].shape[1]

    cap = _vmem_capacity_bytes()
    budget = int(cap * 0.70)
    vmem_limit = min(int(cap * 0.85), 112 * 1024 * 1024)

    tb = _choose_batch_tile(batch, din_p, h_p, k_p, budget,
                            weight_buffers=1 if single_buffer_weights else 2)
    grid = (pl.cdiv(batch, tb),)

    const = lambda i: (0, 0)   # weights / biases / centers: VMEM-resident
    const_kw = dict(pipeline_mode=pl.Buffered(1)) if single_buffer_weights else {}
    in_specs = [
        pl.BlockSpec((tb, din_p), lambda i: (i, 0)),            # x: tiled over batch
        pl.BlockSpec((din_p, h_p), const, **const_kw),          # w1 (bf16)
        pl.BlockSpec((1, h_p), const, **const_kw),              # b1 (f32)
        pl.BlockSpec((h_p, h_p), const, **const_kw),            # w2 (bf16)
        pl.BlockSpec((1, h_p), const, **const_kw),              # b2 (f32)
        pl.BlockSpec((h_p, k_p), const, **const_kw),            # centers^T (bf16)
        pl.BlockSpec((1, k_p), const, **const_kw),              # ||c||^2 (+pad mask)
    ]

    return pl.pallas_call(
        _make_dec_kernel(alpha),
        out_shape=jax.ShapeDtypeStruct((batch, k_p), jnp.float32),
        grid=grid,
        in_specs=in_specs,
        out_specs=pl.BlockSpec((tb, k_p), lambda i: (i, 0)),
        compiler_params=pltpu.CompilerParams(
            dimension_semantics=("parallel",),
            vmem_limit_bytes=vmem_limit,
        ),
    )(x_p, params["w1"], params["b1"], params["w2"], params["b2"],
      params["ct"], params["csq"])


def dec_forward(x, params, alpha: float = 1.0):
    """DEC forward.  x: [B, Din] float; params from prepare_dec_params.  Returns [B, K]."""
    B, din = x.shape
    assert din == params["din"]
    din_p = params["w1"].shape[0]
    K = params["k"]

    x = x.astype(jnp.float32)
    if din != din_p:
        # Feature-dim pad only (mathematically inert); no host-side batch pad —
        # the ragged last batch tile is handled by the cdiv grid (writes clipped).
        x = jnp.pad(x, ((0, 0), (0, din_p - din)))

    try:
        out = _dec_call(x, params, alpha, B, single_buffer_weights=True)
    except Exception:
        # pipeline_mode=pl.Buffered(1) not supported by this jax build:
        # fall back to default double-buffering (tile re-sized accordingly).
        out = _dec_call(x, params, alpha, B, single_buffer_weights=False)

    return out[:, :K]


if __name__ == "__main__":
    # Small, forward-consistent shapes.
    B = 8            # batch size
    INPUT_DIM = 32   # input_dim
    HIDDEN = 32      # hidden_dimension (embedding dim of cluster centers)
    K = 4            # cluster_number
    ALPHA = 1.0

    key = jax.random.PRNGKey(0)
    kx, kw1, kb1, kw2, kb2, kc = jax.random.split(key, 6)

    def xavier(k, fan_in, fan_out, shape):
        limit = (6.0 / (fan_in + fan_out)) ** 0.5
        return jax.random.uniform(k, shape, jnp.float32, -limit, limit)

    x = jax.random.normal(kx, (B, INPUT_DIM), dtype=jnp.float32)
    w1 = xavier(kw1, INPUT_DIM, HIDDEN, (INPUT_DIM, HIDDEN))   # pre-transposed
    b1 = xavier(kb1, 1, HIDDEN, (HIDDEN,))
    w2 = xavier(kw2, HIDDEN, HIDDEN, (HIDDEN, HIDDEN))         # pre-transposed
    b2 = xavier(kb2, 1, HIDDEN, (HIDDEN,))
    centers = xavier(kc, K, HIDDEN, (K, HIDDEN))

    params = prepare_dec_params(w1, b1, w2, b2, centers)       # one-time prep
    out = dec_forward(x, params, alpha=ALPHA)
    out = jax.block_until_ready(out)

    # Reference check in plain f32 JAX (same math as the PyTorch module).
    h_ref = jnp.maximum(x @ w1 + b1, 0.0)
    e_ref = h_ref @ w2 + b2
    ns = jnp.sum((e_ref[:, None, :] - centers[None, :, :]) ** 2, axis=2)
    num = 1.0 / (1.0 + ns / ALPHA)
    num = num ** (float(ALPHA + 1.0) / 2.0)
    ref = num / jnp.sum(num, axis=1, keepdims=True)

    assert out.shape == (B, K)
    err = float(jnp.max(jnp.abs(out - ref)))
    # bf16 MXU operands + approx reciprocal vs. a pure-f32 reference.
    assert jnp.allclose(out, ref, atol=2e-2, rtol=2e-2), err
    print("KERNEL_OK")
</pallas_src>

<mosaic_0001>
module attributes {stable_mosaic.version = 11 : i64} {
  func.func @dec_kernel(%arg0: i32, %arg1: memref<8x128xf32, #tpu.memory_space<vmem>>, %arg2: memref<128x128xbf16, #tpu.memory_space<vmem>>, %arg3: memref<1x128xf32, #tpu.memory_space<vmem>>, %arg4: memref<128x128xbf16, #tpu.memory_space<vmem>>, %arg5: memref<1x128xf32, #tpu.memory_space<vmem>>, %arg6: memref<128x128xbf16, #tpu.memory_space<vmem>>, %arg7: memref<1x128xf32, #tpu.memory_space<vmem>>, %arg8: memref<8x128xf32, #tpu.memory_space<vmem>>) attributes {dimension_semantics = [#tpu.dimension_semantics<parallel>], iteration_bounds = array<i64: 1>, scalar_prefetch = 0 : i64, scratch_operands = 0 : i64, tpu.core_type = #tpu.core_type<tc>, window_params = [{transform_indices = @transform_0, window_bounds = array<i64: 8, 128>}, {pipeline_mode = #tpu.pipeline_mode<synchronous>, transform_indices = @transform_1, window_bounds = array<i64: 128, 128>}, {pipeline_mode = #tpu.pipeline_mode<synchronous>, transform_indices = @transform_2, window_bounds = array<i64: 1, 128>}, {pipeline_mode = #tpu.pipeline_mode<synchronous>, transform_indices = @transform_3, window_bounds = array<i64: 128, 128>}, {pipeline_mode = #tpu.pipeline_mode<synchronous>, transform_indices = @transform_4, window_bounds = array<i64: 1, 128>}, {pipeline_mode = #tpu.pipeline_mode<synchronous>, transform_indices = @transform_5, window_bounds = array<i64: 128, 128>}, {pipeline_mode = #tpu.pipeline_mode<synchronous>, transform_indices = @transform_6, window_bounds = array<i64: 1, 128>}, {transform_indices = @transform_7, window_bounds = array<i64: 8, 128>}]} {
    %c0 = arith.constant 0 : index
    %c0_0 = arith.constant 0 : index
    %0 = vector.load %arg1[%c0, %c0_0] : memref<8x128xf32, #tpu.memory_space<vmem>>, vector<8x128xf32>
    %1 = arith.truncf %0 : vector<8x128xf32> to vector<8x128xbf16>
    %c0_1 = arith.constant 0 : index
    %c0_2 = arith.constant 0 : index
    %2 = vector.load %arg2[%c0_1, %c0_2] : memref<128x128xbf16, #tpu.memory_space<vmem>>, vector<128x128xbf16>
    %cst = arith.constant dense<0.000000e+00> : vector<8x128xf32>
    %3 = tpu.matmul %1, %2, %cst {dimension_numbers = #tpu.dot_dimension_numbers<[1], [0], [0], [1], [0, 0, 1, 1], [], []>} : vector<8x128xbf16>, vector<128x128xbf16>, vector<8x128xf32> -> vector<8x128xf32>
    %c0_3 = arith.constant 0 : index
    %c0_4 = arith.constant 0 : index
    %4 = vector.load %arg3[%c0_3, %c0_4] : memref<1x128xf32, #tpu.memory_space<vmem>>, vector<1x128xf32>
    %5 = vector.broadcast %4 : vector<1x128xf32> to vector<8x128xf32>
    %6 = arith.addf %3, %5 : vector<8x128xf32>
    %cst_5 = arith.constant 0.000000e+00 : f32
    %7 = vector.broadcast %cst_5 : f32 to vector<8x128xf32>
    %8 = arith.maximumf %6, %7 : vector<8x128xf32>
    %9 = arith.truncf %8 : vector<8x128xf32> to vector<8x128xbf16>
    %c0_6 = arith.constant 0 : index
    %c0_7 = arith.constant 0 : index
    %10 = vector.load %arg4[%c0_6, %c0_7] : memref<128x128xbf16, #tpu.memory_space<vmem>>, vector<128x128xbf16>
    %cst_8 = arith.constant dense<0.000000e+00> : vector<8x128xf32>
    %11 = tpu.matmul %9, %10, %cst_8 {dimension_numbers = #tpu.dot_dimension_numbers<[1], [0], [0], [1], [0, 0, 1, 1], [], []>} : vector<8x128xbf16>, vector<128x128xbf16>, vector<8x128xf32> -> vector<8x128xf32>
    %c0_9 = arith.constant 0 : index
    %c0_10 = arith.constant 0 : index
    %12 = vector.load %arg5[%c0_9, %c0_10] : memref<1x128xf32, #tpu.memory_space<vmem>>, vector<1x128xf32>
    %13 = vector.broadcast %12 : vector<1x128xf32> to vector<8x128xf32>
    %14 = arith.addf %11, %13 : vector<8x128xf32>
    %15 = arith.mulf %14, %14 : vector<8x128xf32>
    %cst_11 = arith.constant dense<0.000000e+00> : vector<8xf32>
    %16 = vector.multi_reduction <add>, %15, %cst_11 [1] : vector<8x128xf32> to vector<8xf32>
    %17 = vector.shape_cast %16 : vector<8xf32> to vector<8x1xf32>
    %18 = arith.truncf %14 : vector<8x128xf32> to vector<8x128xbf16>
    %c0_12 = arith.constant 0 : index
    %c0_13 = arith.constant 0 : index
    %19 = vector.load %arg6[%c0_12, %c0_13] : memref<128x128xbf16, #tpu.memory_space<vmem>>, vector<128x128xbf16>
    %cst_14 = arith.constant dense<0.000000e+00> : vector<8x128xf32>
    %20 = tpu.matmul %18, %19, %cst_14 {dimension_numbers = #tpu.dot_dimension_numbers<[1], [0], [0], [1], [0, 0, 1, 1], [], []>} : vector<8x128xbf16>, vector<128x128xbf16>, vector<8x128xf32> -> vector<8x128xf32>
    %c0_15 = arith.constant 0 : index
    %c0_16 = arith.constant 0 : index
    %21 = vector.load %arg7[%c0_15, %c0_16] : memref<1x128xf32, #tpu.memory_space<vmem>>, vector<1x128xf32>
    %22 = vector.broadcast %17 : vector<8x1xf32> to vector<8x128xf32>
    %23 = vector.broadcast %21 : vector<1x128xf32> to vector<8x128xf32>
    %24 = arith.addf %22, %23 : vector<8x128xf32>
    %cst_17 = arith.constant 2.000000e+00 : f32
    %25 = vector.broadcast %cst_17 : f32 to vector<8x128xf32>
    %26 = arith.mulf %25, %20 : vector<8x128xf32>
    %27 = arith.subf %24, %26 : vector<8x128xf32>
    %cst_18 = arith.constant 0.000000e+00 : f32
    %28 = vector.broadcast %cst_18 : f32 to vector<8x128xf32>
    %29 = arith.maximumf %27, %28 : vector<8x128xf32>
    %cst_19 = arith.constant 1.000000e+00 : f32
    %30 = vector.broadcast %cst_19 : f32 to vector<8x128xf32>
    %31 = arith.mulf %29, %30 : vector<8x128xf32>
    %cst_20 = arith.constant 1.000000e+00 : f32
    %32 = vector.broadcast %cst_20 : f32 to vector<8x128xf32>
    %33 = arith.addf %32, %31 : vector<8x128xf32>
    %34 = tpu.reciprocal %33 {approx = true} : vector<8x128xf32> -> vector<8x128xf32>
    %cst_21 = arith.constant dense<0.000000e+00> : vector<8xf32>
    %35 = vector.multi_reduction <add>, %34, %cst_21 [1] : vector<8x128xf32> to vector<8xf32>
    %36 = vector.shape_cast %35 : vector<8xf32> to vector<8x1xf32>
    %37 = tpu.reciprocal %36 {approx = true} : vector<8x1xf32> -> vector<8x1xf32>
    %38 = vector.broadcast %37 : vector<8x1xf32> to vector<8x128xf32>
    %39 = arith.mulf %34, %38 : vector<8x128xf32>
    %c0_22 = arith.constant 0 : index
    %c0_23 = arith.constant 0 : index
    %40 = vector.load %arg8[%c0_22, %c0_23] : memref<8x128xf32, #tpu.memory_space<vmem>>, vector<8x128xf32>
    tpu.vector_store %arg8[%c0_22, %c0_23], %39 {strides = array<i32>} : memref<8x128xf32, #tpu.memory_space<vmem>>, vector<8x128xf32>,
    return
  }
  func.func @transform_0(%arg0: i32) -> (i32, i32) {
    %c0_i32 = arith.constant 0 : i32
    %c0_i32_0 = arith.constant 0 : i32
    return %arg0, %c0_i32 : i32, i32
  }
  func.func @transform_1(%arg0: i32) -> (i32, i32) {
    %c0_i32 = arith.constant 0 : i32
    %c0_i32_0 = arith.constant 0 : i32
    %c0_i32_1 = arith.constant 0 : i32
    return %c0_i32, %c0_i32_0 : i32, i32
  }
  func.func @transform_2(%arg0: i32) -> (i32, i32) {
    %c0_i32 = arith.constant 0 : i32
    %c0_i32_0 = arith.constant 0 : i32
    %c0_i32_1 = arith.constant 0 : i32
    return %c0_i32, %c0_i32_0 : i32, i32
  }
  func.func @transform_3(%arg0: i32) -> (i32, i32) {
    %c0_i32 = arith.constant 0 : i32
    %c0_i32_0 = arith.constant 0 : i32
    %c0_i32_1 = arith.constant 0 : i32
    return %c0_i32, %c0_i32_0 : i32, i32
  }
  func.func @transform_4(%arg0: i32) -> (i32, i32) {
    %c0_i32 = arith.constant 0 : i32
    %c0_i32_0 = arith.constant 0 : i32
    %c0_i32_1 = arith.constant 0 : i32
    return %c0_i32, %c0_i32_0 : i32, i32
  }
  func.func @transform_5(%arg0: i32) -> (i32, i32) {
    %c0_i32 = arith.constant 0 : i32
    %c0_i32_0 = arith.constant 0 : i32
    %c0_i32_1 = arith.constant 0 : i32
    return %c0_i32, %c0_i32_0 : i32, i32
  }
  func.func @transform_6(%arg0: i32) -> (i32, i32) {
    %c0_i32 = arith.constant 0 : i32
    %c0_i32_0 = arith.constant 0 : i32
    %c0_i32_1 = arith.constant 0 : i32
    return %c0_i32, %c0_i32_0 : i32, i32
  }
  func.func @transform_7(%arg0: i32) -> (i32, i32) {
    %c0_i32 = arith.constant 0 : i32
    %c0_i32_0 = arith.constant 0 : i32
    return %arg0, %c0_i32 : i32, i32
  }
}

module attributes {stable_mosaic.version = 11 : i64} {
  func.func @dec_kernel(%arg0: i32, %arg1: memref<8x128xf32, #tpu.memory_space<vmem>>, %arg2: memref<128x128xbf16, #tpu.memory_space<vmem>>, %arg3: memref<1x128xf32, #tpu.memory_space<vmem>>, %arg4: memref<128x128xbf16, #tpu.memory_space<vmem>>, %arg5: memref<1x128xf32, #tpu.memory_space<vmem>>, %arg6: memref<128x128xbf16, #tpu.memory_space<vmem>>, %arg7: memref<1x128xf32, #tpu.memory_space<vmem>>, %arg8: memref<8x128xf32, #tpu.memory_space<vmem>>) attributes {dimension_semantics = [#tpu.dimension_semantics<parallel>], iteration_bounds = array<i64: 1>, scalar_prefetch = 0 : i64, scratch_operands = 0 : i64, tpu.core_type = #tpu.core_type<tc>, window_params = [{transform_indices = @transform_0, window_bounds = array<i64: 8, 128>}, {pipeline_mode = #tpu.pipeline_mode<synchronous>, transform_indices = @transform_1, window_bounds = array<i64: 128, 128>}, {pipeline_mode = #tpu.pipeline_mode<synchronous>, transform_indices = @transform_2, window_bounds = array<i64: 1, 128>}, {pipeline_mode = #tpu.pipeline_mode<synchronous>, transform_indices = @transform_3, window_bounds = array<i64: 128, 128>}, {pipeline_mode = #tpu.pipeline_mode<synchronous>, transform_indices = @transform_4, window_bounds = array<i64: 1, 128>}, {pipeline_mode = #tpu.pipeline_mode<synchronous>, transform_indices = @transform_5, window_bounds = array<i64: 128, 128>}, {pipeline_mode = #tpu.pipeline_mode<synchronous>, transform_indices = @transform_6, window_bounds = array<i64: 1, 128>}, {transform_indices = @transform_7, window_bounds = array<i64: 8, 128>}]} {
    %c0 = arith.constant 0 : index
    %c0_0 = arith.constant 0 : index
    %0 = vector.load %arg1[%c0, %c0_0] : memref<8x128xf32, #tpu.memory_space<vmem>>, vector<8x128xf32>
    %1 = arith.truncf %0 : vector<8x128xf32> to vector<8x128xbf16>
    %c0_1 = arith.constant 0 : index
    %c0_2 = arith.constant 0 : index
    %2 = vector.load %arg2[%c0_1, %c0_2] : memref<128x128xbf16, #tpu.memory_space<vmem>>, vector<128x128xbf16>
    %cst = arith.constant dense<0.000000e+00> : vector<8x128xf32>
    %3 = tpu.matmul %1, %2, %cst {dimension_numbers = #tpu.dot_dimension_numbers<[1], [0], [0], [1], [0, 0, 1, 1], [], []>} : vector<8x128xbf16>, vector<128x128xbf16>, vector<8x128xf32> -> vector<8x128xf32>
    %c0_3 = arith.constant 0 : index
    %c0_4 = arith.constant 0 : index
    %4 = vector.load %arg3[%c0_3, %c0_4] : memref<1x128xf32, #tpu.memory_space<vmem>>, vector<1x128xf32>
    %5 = vector.broadcast %4 : vector<1x128xf32> to vector<8x128xf32>
    %6 = arith.addf %3, %5 : vector<8x128xf32>
    %cst_5 = arith.constant 0.000000e+00 : f32
    %7 = vector.broadcast %cst_5 : f32 to vector<8x128xf32>
    %8 = arith.maximumf %6, %7 : vector<8x128xf32>
    %9 = arith.truncf %8 : vector<8x128xf32> to vector<8x128xbf16>
    %c0_6 = arith.constant 0 : index
    %c0_7 = arith.constant 0 : index
    %10 = vector.load %arg4[%c0_6, %c0_7] : memref<128x128xbf16, #tpu.memory_space<vmem>>, vector<128x128xbf16>
    %cst_8 = arith.constant dense<0.000000e+00> : vector<8x128xf32>
    %11 = tpu.matmul %9, %10, %cst_8 {dimension_numbers = #tpu.dot_dimension_numbers<[1], [0], [0], [1], [0, 0, 1, 1], [], []>} : vector<8x128xbf16>, vector<128x128xbf16>, vector<8x128xf32> -> vector<8x128xf32>
    %c0_9 = arith.constant 0 : index
    %c0_10 = arith.constant 0 : index
    %12 = vector.load %arg5[%c0_9, %c0_10] : memref<1x128xf32, #tpu.memory_space<vmem>>, vector<1x128xf32>
    %13 = vector.broadcast %12 : vector<1x128xf32> to vector<8x128xf32>
    %14 = arith.addf %11, %13 : vector<8x128xf32>
    %15 = arith.mulf %14, %14 : vector<8x128xf32>
    %cst_11 = arith.constant dense<0.000000e+00> : vector<8xf32>
    %16 = vector.multi_reduction <add>, %15, %cst_11 [1] : vector<8x128xf32> to vector<8xf32>
    %17 = vector.shape_cast %16 : vector<8xf32> to vector<8x1xf32>
    %18 = arith.truncf %14 : vector<8x128xf32> to vector<8x128xbf16>
    %c0_12 = arith.constant 0 : index
    %c0_13 = arith.constant 0 : index
    %19 = vector.load %arg6[%c0_12, %c0_13] : memref<128x128xbf16, #tpu.memory_space<vmem>>, vector<128x128xbf16>
    %cst_14 = arith.constant dense<0.000000e+00> : vector<8x128xf32>
    %20 = tpu.matmul %18, %19, %cst_14 {dimension_numbers = #tpu.dot_dimension_numbers<[1], [0], [0], [1], [0, 0, 1, 1], [], []>} : vector<8x128xbf16>, vector<128x128xbf16>, vector<8x128xf32> -> vector<8x128xf32>
    %c0_15 = arith.constant 0 : index
    %c0_16 = arith.constant 0 : index
    %21 = vector.load %arg7[%c0_15, %c0_16] : memref<1x128xf32, #tpu.memory_space<vmem>>, vector<1x128xf32>
    %22 = vector.broadcast %17 : vector<8x1xf32> to vector<8x128xf32>
    %23 = vector.broadcast %21 : vector<1x128xf32> to vector<8x128xf32>
    %24 = arith.addf %22, %23 : vector<8x128xf32>
    %cst_17 = arith.constant 2.000000e+00 : f32
    %25 = vector.broadcast %cst_17 : f32 to vector<8x128xf32>
    %26 = arith.mulf %25, %20 : vector<8x128xf32>
    %27 = arith.subf %24, %26 : vector<8x128xf32>
    %cst_18 = arith.constant 0.000000e+00 : f32
    %28 = vector.broadcast %cst_18 : f32 to vector<8x128xf32>
    %29 = arith.maximumf %27, %28 : vector<8x128xf32>
    %cst_19 = arith.constant 1.000000e+00 : f32
    %30 = vector.broadcast %cst_19 : f32 to vector<8x128xf32>
    %31 = arith.mulf %29, %30 : vector<8x128xf32>
    %cst_20 = arith.constant 1.000000e+00 : f32
    %32 = vector.broadcast %cst_20 : f32 to vector<8x128xf32>
    %33 = arith.addf %32, %31 : vector<8x128xf32>
    %34 = tpu.reciprocal %33 {approx = true} : vector<8x128xf32> -> vector<8x128xf32>
    %cst_21 = arith.constant dense<0.000000e+00> : vector<8xf32>
    %35 = vector.multi_reduction <add>, %34, %cst_21 [1] : vector<8x128xf32> to vector<8xf32>
    %36 = vector.shape_cast %35 : vector<8xf32> to vector<8x1xf32>
    %37 = tpu.reciprocal %36 {approx = true} : vector<8x1xf32> -> vector<8x1xf32>
    %38 = vector.broadcast %37 : vector<8x1xf32> to vector<8x128xf32>
    %39 = arith.mulf %34, %38 : vector<8x128xf32>
    %c0_22 = arith.constant 0 : index
    %c0_23 = arith.constant 0 : index
    %40 = vector.load %arg8[%c0_22, %c0_23] : memref<8x128xf32, #tpu.memory_space<vmem>>, vector<8x128xf32>
    tpu.vector_store %arg8[%c0_22, %c0_23], %39 {strides = array<i32>} : memref<8x128xf32, #tpu.memory_space<vmem>>, vector<8x128xf32>,
    return
  }
  func.func @transform_0(%arg0: i32) -> (i32, i32) {
    %c0_i32 = arith.constant 0 : i32
    %c0_i32_0 = arith.constant 0 : i32
    return %arg0, %c0_i32 : i32, i32
  }
  func.func @transform_1(%arg0: i32) -> (i32, i32) {
    %c0_i32 = arith.constant 0 : i32
    %c0_i32_0 = arith.constant 0 : i32
    %c0_i32_1 = arith.constant 0 : i32
    return %c0_i32, %c0_i32_0 : i32, i32
  }
  func.func @transform_2(%arg0: i32) -> (i32, i32) {
    %c0_i32 = arith.constant 0 : i32
    %c0_i32_0 = arith.constant 0 : i32
    %c0_i32_1 = arith.constant 0 : i32
    return %c0_i32, %c0_i32_0 : i32, i32
  }
  func.func @transform_3(%arg0: i32) -> (i32, i32) {
    %c0_i32 = arith.constant 0 : i32
    %c0_i32_0 = arith.constant 0 : i32
    %c0_i32_1 = arith.constant 0 : i32
    return %c0_i32, %c0_i32_0 : i32, i32
  }
  func.func @transform_4(%arg0: i32) -> (i32, i32) {
    %c0_i32 = arith.constant 0 : i32
    %c0_i32_0 = arith.constant 0 : i32
    %c0_i32_1 = arith.constant 0 : i32
    return %c0_i32, %c0_i32_0 : i32, i32
  }
  func.func @transform_5(%arg0: i32) -> (i32, i32) {
    %c0_i32 = arith.constant 0 : i32
    %c0_i32_0 = arith.constant 0 : i32
    %c0_i32_1 = arith.constant 0 : i32
    return %c0_i32, %c0_i32_0 : i32, i32
  }
  func.func @transform_6(%arg0: i32) -> (i32, i32) {
    %c0_i32 = arith.constant 0 : i32
    %c0_i32_0 = arith.constant 0 : i32
    %c0_i32_1 = arith.constant 0 : i32
    return %c0_i32, %c0_i32_0 : i32, i32
  }
  func.func @transform_7(%arg0: i32) -> (i32, i32) {
    %c0_i32 = arith.constant 0 : i32
    %c0_i32_0 = arith.constant 0 : i32
    return %arg0, %c0_i32 : i32, i32
  }
}

</mosaic_0001>

<bundles_post_ra>
// kernel: tpu_custom_call.1
= control target key start
LH: loop header
LB: loop body
LE: loop exit
PB: predicated region body
PF: predicated region fallthrough
CT: control target
= control target key end

     0   :  { %12 = vsyncpa [#allocation3], 0  ;;  %s702_s0 = inlined_call_operand.hbm [shape: f32[8,128], index: 0, kind: input, shape index: {}]   ;;  %s703_s1 = inlined_call_operand.hbm [shape: bf16[128,128], index: 1, kind: input, shape index: {}]   ;;  %s704_s2 = inlined_call_operand.vmem [shape: f32[1,128], index: 2, kind: input, shape index: {}]   ;;  %s705_s3 = inlined_call_operand.hbm [shape: bf16[128,128], index: 3, kind: input, shape index: {}]   ;;  %s706_s4 = inlined_call_operand.vmem [shape: f32[1,128], index: 4, kind: input, shape index: {}]   ;;  %s707_s5 = inlined_call_operand.hbm [shape: bf16[128,128], index: 5, kind: input, shape index: {}]   ;;  %s708_s6 = inlined_call_operand.vmem [shape: f32[1,128], index: 6, kind: input, shape index: {}]   ;;  %s709_s7 = inlined_call_operand.hbm [shape: f32[8,128], index: 7, kind: output, shape index: {}]  }
   0x1   :  { %13 = vsyncpa [#allocation6], 0 }
   0x2   :  { %14 = vsyncpa [#allocation9], 0  ;;  %s31_s26 = sshll.u32 %s703_s1, 4  ;;  %s32_s26 = int_to_ptr.hbm [resolvable:$true] %s31_s26 }
   0x3   :  { %15 = vsyncpa [#allocation4], 0  ;;  %s631_s27 = smov [#allocation5]   ;;  %s21_s8 = sshll.u32 %s702_s0, 4  ;;  %s22_s8 = int_to_ptr.hbm [resolvable:$true] %s21_s8 }
   0x4   :  { %s33_s28 = sshll.u32 %s631_s27, 4  ;;  %s632_s9 = smov 64   ;;  %s34_s28 = int_to_ptr.vmem [resolvable:$true] %s33_s28 }
   0x5   :  { %s633_s10 = smov 4   ;;  %s634_s11 = smov [#allocation2]  }
   0x6   :  { %39 = dma.hbm_to_vmem [thread:$0]  %s32_s26, 1024, %s34_s28, [#allocation6], %s632_s9, %s632_s9, %s633_s10  }
   0x7   :  { %s23_s12 = sshll.u32 %s634_s11, 4  ;;  %s46_s15 = sshll.u32 %s705_s3, 4  ;;  %s24_s12 = int_to_ptr.vmem [resolvable:$true] %s23_s12  ;;  %s47_s15 = int_to_ptr.hbm [resolvable:$true] %s46_s15 }
   0x8   :  { %26 = dma.hbm_to_vmem [thread:$0]  %s22_s8, 128, %s24_s12, [#allocation3]  }
   0x9   :  { %s61_s17 = sshll.u32 %s707_s5, 4  ;;  %s635_s18 = smov [#allocation7]   ;;  %s62_s17 = int_to_ptr.hbm [resolvable:$true] %s61_s17 }
   0xa   :  { %s48_s19 = sshll.u32 %s635_s18, 4  ;;  %s636_s0 = smov [#allocation8]   ;;  %s49_s19 = int_to_ptr.vmem [resolvable:$true] %s48_s19 }
   0xb   :  { %54 = dma.hbm_to_vmem [thread:$0]  %s47_s15, 1024, %s49_s19, [#allocation6], %s632_s9, %s632_s9, %s633_s10  }
   0xc   :  { %s63_s20 = sshll.u32 %s636_s0, 4  ;;  %s64_s20 = int_to_ptr.vmem [resolvable:$true] %s63_s20 }
   0xd   :  { %69 = dma.hbm_to_vmem [thread:$0]  %s62_s17, 1024, %s64_s20, [#allocation9], %s632_s9, %s632_s9, %s633_s10  }
   0xe   :  { %623 = dma.done.wait [#allocation3], 128  }
   0xf   :  { %624 = vsyncadd [#allocation3], 4294967168 }
  0x10   :  { %625 = dma.done.wait [#allocation6], 2048  }
  0x11   :  { %626 = vsyncadd [#allocation6], 4294965248 }
  0x12   :  { %627 = dma.done.wait [#allocation9], 1024  }
  0x13   :  { %628 = vsyncadd [#allocation9], 4294966272  ;;  %v472_v0 = vld [vmem:[#allocation5 + $0x38] sm:$0xff]  ;;  %v471_v1 = vld [vmem:[#allocation5 + $0x30] sm:$0xff]  ;;  %s357_s27 = sshll.u32 %s709_s7, 4  ;;  %s358_s27 = int_to_ptr.hbm [resolvable:$true] %s357_s27 }
  0x14   :  { %158 = vmatpush.bf16.msra.mxu0 %v472_v0  ;;  %v480_v2 = vld [vmem:[#allocation7 + $0x38] sm:$0xff]  ;;  %v479_v3 = vld [vmem:[#allocation7 + $0x30] sm:$0xff]  ;;  %v470_v4 = vld [vmem:[#allocation5 + $0x28] sm:$0xff] }
  0x15   :  { %241 = vmatpush.bf16.msra.mxu1 %v480_v2  ;;  %v478_v5 = vld [vmem:[#allocation7 + $0x28] sm:$0xff]  ;;  %v469_v6 = vld [vmem:[#allocation5 + $0x20] sm:$0xff]  ;;  %v468_v8 = vld [vmem:[#allocation5 + $0x18] sm:$0xff] }
  0x16   :  { %v477_v7 = vld [vmem:[#allocation7 + $0x20] sm:$0xff]  ;;  %v476_v9 = vld [vmem:[#allocation7 + $0x18] sm:$0xff]  ;;  %v467_v10 = vld [vmem:[#allocation5 + $0x10] sm:$0xff] }
  0x17   :  { %v475_v11 = vld [vmem:[#allocation7 + $0x10] sm:$0xff]  ;;  %v466_v12 = vld [vmem:[#allocation5 + $0x8] sm:$0xff]  ;;  %v465_v13 = vld [vmem:[#allocation5] sm:$0xff] }
  0x18   :  { %159 = vmatpush.bf16.msra.mxu0 %v471_v1  ;;  %v88_v14 = vld [vmem:[#allocation2] sm:$0xff]  ;;  %v474_v16 = vld [vmem:[#allocation7 + $0x8] sm:$0xff]  ;;  %v473_v17 = vld [vmem:[#allocation7] sm:$0xff] }
  0x19   :  { %242 = vmatpush.bf16.msra.mxu1 %v479_v3  ;;  %v89_v15 = vpack.c.bf16 %v88_v14, %v88_v14  ;;  %v488_v18 = vld [vmem:[#allocation8 + $0x38] sm:$0xff]  ;;  %v487_v19 = vld [vmem:[#allocation8 + $0x30] sm:$0xff]  ;;  %v486_v20 = vld [vmem:[#allocation8 + $0x28] sm:$0xff] }
  0x1a   :  { %322 = vmatpush.bf16.msra.mxu2 %v488_v18  ;;  %v485_v21 = vld [vmem:[#allocation8 + $0x20] sm:$0xff]  ;;  %v484_v22 = vld [vmem:[#allocation8 + $0x18] sm:$0xff]  ;;  %v483_v23 = vld [vmem:[#allocation8 + $0x10] sm:$0xff] }
  0x1b   :  { %v496_v24 = vld [vmem:[%s704_s2] ss:$0 sm:$0xff]  ;;  %v482_v25 = vld [vmem:[#allocation8 + $0x8] sm:$0xff]  ;;  %v481_v31 = vld [vmem:[#allocation8] sm:$0xff] }
  0x1c   :  { %160 = vmatpush.bf16.msra.mxu0 %v470_v4  ;;  %v497_v32 = vld [vmem:[%s706_s4] ss:$0 sm:$0xff]  ;;  %s637_s4 = smov [#allocation10]  }
  0x1d   :  { %243 = vmatpush.bf16.msra.mxu1 %v478_v5  ;;  %v498_v38 = vld [vmem:[%s708_s6] ss:$0 sm:$0xff]  ;;  %s355_s24 = sshll.u32 %s637_s4, 4  ;;  %s356_s24 = int_to_ptr.vmem [resolvable:$true] %s355_s24 }
  0x1e   :  { %323 = vmatpush.bf16.msra.mxu2 %v487_v19 }
  0x20   :  { %161 = vmatpush.bf16.msra.mxu0 %v469_v6 }
  0x21   :  { %244 = vmatpush.bf16.msra.mxu1 %v477_v7 }
  0x22   :  { %324 = vmatpush.bf16.msra.mxu2 %v486_v20 }
  0x24   :  { %162 = vmatpush.bf16.msra.mxu0 %v468_v8 }
  0x25   :  { %245 = vmatpush.bf16.msra.mxu1 %v476_v9 }
  0x26   :  { %325 = vmatpush.bf16.msra.mxu2 %v485_v21 }
  0x28   :  { %163 = vmatpush.bf16.msra.mxu0 %v467_v10 }
  0x29   :  { %246 = vmatpush.bf16.msra.mxu1 %v475_v11 }
  0x2a   :  { %326 = vmatpush.bf16.msra.mxu2 %v484_v22 }
  0x2c   :  { %164 = vmatpush.bf16.msra.mxu0 %v466_v12 }
  0x2d   :  { %247 = vmatpush.bf16.msra.mxu1 %v474_v16 }
  0x2e   :  { %327 = vmatpush.bf16.msra.mxu2 %v483_v23 }
  0x30   :  { %165 = vmatpush.bf16.msra.mxu0 %v465_v13 }
  0x31   :  { %248 = vmatpush.bf16.msra.mxu1 %v473_v17 }
  0x32   :  { %328 = vmatpush.bf16.msra.mxu2 %v482_v25 }
  0x33   :  { %166 = vmatmul.bf16.vlgmr.msra.gmra.mxu0 %v89_v15 }
  0x36   :  { %329 = vmatpush.bf16.msra.mxu2 %v481_v31 }
  0xb0   :  { %v167_v26 = vpop.f32.mrf.mxu0 }
  0xb1   :  { %v168_v27 = vadd.f32 %v496_v24, %v167_v26 }
  0xb3   :  { %v171_v28 = vmax.f32 %v168_v27, 0.0 }
  0xb5   :  { %v172_v29 = vpack.c.bf16 %v171_v28, %v171_v28 }
  0xb7   :  { %249 = vmatmul.bf16.vlgmr.msra.gmra.mxu1 %v172_v29 }
  0xb8   :  { %v169_v30 = vpop.f32.mrf.mxu0 }
 0x134   :  { %v250_v33 = vpop.f32.mrf.mxu1 }
 0x135   :  { %v251_v34 = vadd.f32 %v497_v32, %v250_v33 }
 0x137   :  { %v257_v35 = vpack.c.bf16 %v251_v34, %v251_v34  ;;  %v254_v36 = vmul.f32 %v251_v34, %v251_v34 }
 0x139   :  { %330 = vmatmul.bf16.vlgmr.msra.gmra.mxu2 %v257_v35  ;;  %255 = vadd.xlane.f32.xlu0 %v254_v36 }
 0x13c   :  { %v252_v37 = vpop.f32.mrf.mxu1 }
 0x1ac   :  { %v256_v39 = vpop.xlane.xlu0 %255 }
 0x1ad   :  { %v339_v41 = vadd.f32 %v498_v38, %v256_v39 }
 0x1bc   :  { %v331_v40 = vpop.f32.mrf.mxu2 }
 0x1bd   :  { %v340_v42 = vmul.f32 2.0, %v331_v40 }
 0x1bf   :  { %v341_v43 = vsub.f32 %v339_v41, %v340_v42 }
 0x1c1   :  { %v342_v44 = vmax.f32 %v341_v43, 0.0 }
 0x1c3   :  { %v343_v45 = vadd.f32 1.0, %v342_v44 }
 0x1c4   :  { %v333_v46 = vpop.f32.mrf.mxu2 }
 0x1c5   :  { %499 = vrcp.f32 %v343_v45 }
 0x1cb   :  { %v500_v47 = vpop.eup %499 }
 0x1cc   :  { %345 = vadd.xlane.f32.xlu0 %v500_v47 }
 0x23f   :  { %v346_v48 = vpop.xlane.xlu0 %345 }
 0x240   :  { %501 = vrcp.f32 %v346_v48 }
 0x246   :  { %v502_v49 = vpop.eup %501 }
 0x247   :  { %v348_v50 = vmul.f32 %v502_v49, %v500_v47 }
 0x249   :  { %349 = vst [vmem:[#allocation10] sm:$0xff] %v348_v50 }
 0x24a   :  { %360 = dma.vmem_to_hbm [thread:$0]  %s356_s24, 128, %s358_s27, [#allocation4]  }
 0x24b   :  { %629 = dma.done.wait [#allocation4], 128  }
 0x24c   :  { %630 = vsyncadd [#allocation4], 4294967168 }
 0x24d   :  { %365 = vsyncpa [#allocation3], 1 }
 0x24e   :  { %366 = vsyncpa [#allocation6], 1 }
 0x24f   :  { %367 = vsyncpa [#allocation9], 1 }
 0x250   :  { %368 = vsyncpa [#allocation4], 1 }

// kernel: tpu_custom_call.1
= control target key start
LH: loop header
LB: loop body
LE: loop exit
PB: predicated region body
PF: predicated region fallthrough
CT: control target
= control target key end

     0   :  { %12 = vsyncpa [#allocation3], 0  ;;  %s702_s0 = inlined_call_operand.hbm [shape: f32[8,128], index: 0, kind: input, shape index: {}]   ;;  %s703_s1 = inlined_call_operand.hbm [shape: bf16[128,128], index: 1, kind: input, shape index: {}]   ;;  %s704_s2 = inlined_call_operand.vmem [shape: f32[1,128], index: 2, kind: input, shape index: {}]   ;;  %s705_s3 = inlined_call_operand.hbm [shape: bf16[128,128], index: 3, kind: input, shape index: {}]   ;;  %s706_s4 = inlined_call_operand.vmem [shape: f32[1,128], index: 4, kind: input, shape index: {}]   ;;  %s707_s5 = inlined_call_operand.hbm [shape: bf16[128,128], index: 5, kind: input, shape index: {}]   ;;  %s708_s6 = inlined_call_operand.vmem [shape: f32[1,128], index: 6, kind: input, shape index: {}]   ;;  %s709_s7 = inlined_call_operand.hbm [shape: f32[8,128], index: 7, kind: output, shape index: {}]  }
   0x1   :  { %13 = vsyncpa [#allocation6], 0 }
   0x2   :  { %14 = vsyncpa [#allocation9], 0  ;;  %s31_s26 = sshll.u32 %s703_s1, 4  ;;  %s32_s26 = int_to_ptr.hbm [resolvable:$true] %s31_s26 }
   0x3   :  { %15 = vsyncpa [#allocation4], 0  ;;  %s631_s27 = smov [#allocation5]   ;;  %s21_s8 = sshll.u32 %s702_s0, 4  ;;  %s22_s8 = int_to_ptr.hbm [resolvable:$true] %s21_s8 }
   0x4   :  { %s33_s28 = sshll.u32 %s631_s27, 4  ;;  %s632_s9 = smov 64   ;;  %s34_s28 = int_to_ptr.vmem [resolvable:$true] %s33_s28 }
   0x5   :  { %s633_s10 = smov 4   ;;  %s634_s11 = smov [#allocation2]  }
   0x6   :  { %39 = dma.hbm_to_vmem [thread:$0]  %s32_s26, 1024, %s34_s28, [#allocation6], %s632_s9, %s632_s9, %s633_s10  }
   0x7   :  { %s23_s12 = sshll.u32 %s634_s11, 4  ;;  %s46_s15 = sshll.u32 %s705_s3, 4  ;;  %s24_s12 = int_to_ptr.vmem [resolvable:$true] %s23_s12  ;;  %s47_s15 = int_to_ptr.hbm [resolvable:$true] %s46_s15 }
   0x8   :  { %26 = dma.hbm_to_vmem [thread:$0]  %s22_s8, 128, %s24_s12, [#allocation3]  }
   0x9   :  { %s61_s17 = sshll.u32 %s707_s5, 4  ;;  %s635_s18 = smov [#allocation7]   ;;  %s62_s17 = int_to_ptr.hbm [resolvable:$true] %s61_s17 }
   0xa   :  { %s48_s19 = sshll.u32 %s635_s18, 4  ;;  %s636_s0 = smov [#allocation8]   ;;  %s49_s19 = int_to_ptr.vmem [resolvable:$true] %s48_s19 }
   0xb   :  { %54 = dma.hbm_to_vmem [thread:$0]  %s47_s15, 1024, %s49_s19, [#allocation6], %s632_s9, %s632_s9, %s633_s10  }
   0xc   :  { %s63_s20 = sshll.u32 %s636_s0, 4  ;;  %s64_s20 = int_to_ptr.vmem [resolvable:$true] %s63_s20 }
   0xd   :  { %69 = dma.hbm_to_vmem [thread:$0]  %s62_s17, 1024, %s64_s20, [#allocation9], %s632_s9, %s632_s9, %s633_s10  }
   0xe   :  { %623 = dma.done.wait [#allocation3], 128  }
   0xf   :  { %624 = vsyncadd [#allocation3], 4294967168 }
  0x10   :  { %625 = dma.done.wait [#allocation6], 2048  }
  0x11   :  { %626 = vsyncadd [#allocation6], 4294965248 }
  0x12   :  { %627 = dma.done.wait [#allocation9], 1024  }
  0x13   :  { %628 = vsyncadd [#allocation9], 4294966272  ;;  %v472_v0 = vld [vmem:[#allocation5 + $0x38] sm:$0xff]  ;;  %v471_v1 = vld [vmem:[#allocation5 + $0x30] sm:$0xff]  ;;  %s357_s27 = sshll.u32 %s709_s7, 4  ;;  %s358_s27 = int_to_ptr.hbm [resolvable:$true] %s357_s27 }
  0x14   :  { %158 = vmatpush.bf16.msra.mxu0 %v472_v0  ;;  %v480_v2 = vld [vmem:[#allocation7 + $0x38] sm:$0xff]  ;;  %v479_v3 = vld [vmem:[#allocation7 + $0x30] sm:$0xff]  ;;  %v470_v4 = vld [vmem:[#allocation5 + $0x28] sm:$0xff] }
  0x15   :  { %241 = vmatpush.bf16.msra.mxu1 %v480_v2  ;;  %v478_v5 = vld [vmem:[#allocation7 + $0x28] sm:$0xff]  ;;  %v469_v6 = vld [vmem:[#allocation5 + $0x20] sm:$0xff]  ;;  %v468_v8 = vld [vmem:[#allocation5 + $0x18] sm:$0xff] }
  0x16   :  { %v477_v7 = vld [vmem:[#allocation7 + $0x20] sm:$0xff]  ;;  %v476_v9 = vld [vmem:[#allocation7 + $0x18] sm:$0xff]  ;;  %v467_v10 = vld [vmem:[#allocation5 + $0x10] sm:$0xff] }
  0x17   :  { %v475_v11 = vld [vmem:[#allocation7 + $0x10] sm:$0xff]  ;;  %v466_v12 = vld [vmem:[#allocation5 + $0x8] sm:$0xff]  ;;  %v465_v13 = vld [vmem:[#allocation5] sm:$0xff] }
  0x18   :  { %159 = vmatpush.bf16.msra.mxu0 %v471_v1  ;;  %v88_v14 = vld [vmem:[#allocation2] sm:$0xff]  ;;  %v474_v16 = vld [vmem:[#allocation7 + $0x8] sm:$0xff]  ;;  %v473_v17 = vld [vmem:[#allocation7] sm:$0xff] }
  0x19   :  { %242 = vmatpush.bf16.msra.mxu1 %v479_v3  ;;  %v89_v15 = vpack.c.bf16 %v88_v14, %v88_v14  ;;  %v488_v18 = vld [vmem:[#allocation8 + $0x38] sm:$0xff]  ;;  %v487_v19 = vld [vmem:[#allocation8 + $0x30] sm:$0xff]  ;;  %v486_v20 = vld [vmem:[#allocation8 + $0x28] sm:$0xff] }
  0x1a   :  { %322 = vmatpush.bf16.msra.mxu2 %v488_v18  ;;  %v485_v21 = vld [vmem:[#allocation8 + $0x20] sm:$0xff]  ;;  %v484_v22 = vld [vmem:[#allocation8 + $0x18] sm:$0xff]  ;;  %v483_v23 = vld [vmem:[#allocation8 + $0x10] sm:$0xff] }
  0x1b   :  { %v496_v24 = vld [vmem:[%s704_s2] ss:$0 sm:$0xff]  ;;  %v482_v25 = vld [vmem:[#allocation8 + $0x8] sm:$0xff]  ;;  %v481_v31 = vld [vmem:[#allocation8] sm:$0xff] }
  0x1c   :  { %160 = vmatpush.bf16.msra.mxu0 %v470_v4  ;;  %v497_v32 = vld [vmem:[%s706_s4] ss:$0 sm:$0xff]  ;;  %s637_s4 = smov [#allocation10]  }
  0x1d   :  { %243 = vmatpush.bf16.msra.mxu1 %v478_v5  ;;  %v498_v38 = vld [vmem:[%s708_s6] ss:$0 sm:$0xff]  ;;  %s355_s24 = sshll.u32 %s637_s4, 4  ;;  %s356_s24 = int_to_ptr.vmem [resolvable:$true] %s355_s24 }
  0x1e   :  { %323 = vmatpush.bf16.msra.mxu2 %v487_v19 }
  0x20   :  { %161 = vmatpush.bf16.msra.mxu0 %v469_v6 }
  0x21   :  { %244 = vmatpush.bf16.msra.mxu1 %v477_v7 }
  0x22   :  { %324 = vmatpush.bf16.msra.mxu2 %v486_v20 }
  0x24   :  { %162 = vmatpush.bf16.msra.mxu0 %v468_v8 }
  0x25   :  { %245 = vmatpush.bf16.msra.mxu1 %v476_v9 }
  0x26   :  { %325 = vmatpush.bf16.msra.mxu2 %v485_v21 }
  0x28   :  { %163 = vmatpush.bf16.msra.mxu0 %v467_v10 }
  0x29   :  { %246 = vmatpush.bf16.msra.mxu1 %v475_v11 }
  0x2a   :  { %326 = vmatpush.bf16.msra.mxu2 %v484_v22 }
  0x2c   :  { %164 = vmatpush.bf16.msra.mxu0 %v466_v12 }
  0x2d   :  { %247 = vmatpush.bf16.msra.mxu1 %v474_v16 }
  0x2e   :  { %327 = vmatpush.bf16.msra.mxu2 %v483_v23 }
  0x30   :  { %165 = vmatpush.bf16.msra.mxu0 %v465_v13 }
  0x31   :  { %248 = vmatpush.bf16.msra.mxu1 %v473_v17 }
  0x32   :  { %328 = vmatpush.bf16.msra.mxu2 %v482_v25 }
  0x33   :  { %166 = vmatmul.bf16.vlgmr.msra.gmra.mxu0 %v89_v15 }
  0x36   :  { %329 = vmatpush.bf16.msra.mxu2 %v481_v31 }
  0xb0   :  { %v167_v26 = vpop.f32.mrf.mxu0 }
  0xb1   :  { %v168_v27 = vadd.f32 %v496_v24, %v167_v26 }
  0xb3   :  { %v171_v28 = vmax.f32 %v168_v27, 0.0 }
  0xb5   :  { %v172_v29 = vpack.c.bf16 %v171_v28, %v171_v28 }
  0xb7   :  { %249 = vmatmul.bf16.vlgmr.msra.gmra.mxu1 %v172_v29 }
  0xb8   :  { %v169_v30 = vpop.f32.mrf.mxu0 }
 0x134   :  { %v250_v33 = vpop.f32.mrf.mxu1 }
 0x135   :  { %v251_v34 = vadd.f32 %v497_v32, %v250_v33 }
 0x137   :  { %v257_v35 = vpack.c.bf16 %v251_v34, %v251_v34  ;;  %v254_v36 = vmul.f32 %v251_v34, %v251_v34 }
 0x139   :  { %330 = vmatmul.bf16.vlgmr.msra.gmra.mxu2 %v257_v35  ;;  %255 = vadd.xlane.f32.xlu0 %v254_v36 }
 0x13c   :  { %v252_v37 = vpop.f32.mrf.mxu1 }
 0x1ac   :  { %v256_v39 = vpop.xlane.xlu0 %255 }
 0x1ad   :  { %v339_v41 = vadd.f32 %v498_v38, %v256_v39 }
 0x1bc   :  { %v331_v40 = vpop.f32.mrf.mxu2 }
 0x1bd   :  { %v340_v42 = vmul.f32 2.0, %v331_v40 }
 0x1bf   :  { %v341_v43 = vsub.f32 %v339_v41, %v340_v42 }
 0x1c1   :  { %v342_v44 = vmax.f32 %v341_v43, 0.0 }
 0x1c3   :  { %v343_v45 = vadd.f32 1.0, %v342_v44 }
 0x1c4   :  { %v333_v46 = vpop.f32.mrf.mxu2 }
 0x1c5   :  { %499 = vrcp.f32 %v343_v45 }
 0x1cb   :  { %v500_v47 = vpop.eup %499 }
 0x1cc   :  { %345 = vadd.xlane.f32.xlu0 %v500_v47 }
 0x23f   :  { %v346_v48 = vpop.xlane.xlu0 %345 }
 0x240   :  { %501 = vrcp.f32 %v346_v48 }
 0x246   :  { %v502_v49 = vpop.eup %501 }
 0x247   :  { %v348_v50 = vmul.f32 %v502_v49, %v500_v47 }
 0x249   :  { %349 = vst [vmem:[#allocation10] sm:$0xff] %v348_v50 }
 0x24a   :  { %360 = dma.vmem_to_hbm [thread:$0]  %s356_s24, 128, %s358_s27, [#allocation4]  }
 0x24b   :  { %629 = dma.done.wait [#allocation4], 128  }
 0x24c   :  { %630 = vsyncadd [#allocation4], 4294967168 }
 0x24d   :  { %365 = vsyncpa [#allocation3], 1 }
 0x24e   :  { %366 = vsyncpa [#allocation6], 1 }
 0x24f   :  { %367 = vsyncpa [#allocation9], 1 }
 0x250   :  { %368 = vsyncpa [#allocation4], 1 }

</bundles_post_ra>
